<compile_context>
chip_gen: v7x
topology: tpu7x:2x2x1
jax: 0.10.0
libtpu: 0.0.40
codegen_flags: <defaults>
</compile_context>

<pallas_src>
import functools

import jax
import jax.numpy as jnp
from jax.experimental import pallas as pl
from jax.experimental.pallas import tpu as pltpu


_VMEM_LIMIT = 48 * 1024 * 1024  # safe on v5e/v6e (128 MiB) and v7x (64 MiB physical)

_COMPILER_PARAMS = pltpu.CompilerParams(
    dimension_semantics=("parallel", "parallel"),
    vmem_limit_bytes=_VMEM_LIMIT,
)


# --------------------------------------------------------------------------------------
# Kernel 1: channels-last permute  (bs, na, no, ny, nx) -> (bs, na, ny, nx, no)
# --------------------------------------------------------------------------------------
def _permute_kernel(x_ref, o_ref):
    # x_ref: (1, no_pad, hw_tile)   o_ref: (1, hw_tile, no_pad)
    o_ref[0] = x_ref[0].T


def _permute_channels_last(p4, na, no):
    """p4: (bs, na*no, ny, nx)  ->  (bs, na, ny, nx, no) using a Pallas transpose kernel."""
    bs, c, ny, nx = p4.shape
    assert c == na * no
    hw = ny * nx
    rows = bs * na
    x3 = p4.reshape(rows, no, hw)

    # Pad `no` to a multiple of 8 so the in-kernel transpose is sublane aligned.
    no_pad = -(-no // 8) * 8
    if no_pad != no:
        x3 = jnp.pad(x3, ((0, 0), (0, no_pad - no), (0, 0)))

    # Lane-dense spatial tiles (multiples of 128); cdiv grid handles ragged last block.
    if hw % 128 == 0:
        hw_tile = min(hw, 2048)
    else:
        hw_tile = hw  # full-dim block is always legal

    grid = (rows, pl.cdiv(hw, hw_tile))
    out3 = pl.pallas_call(
        _permute_kernel,
        out_shape=jax.ShapeDtypeStruct((rows, hw, no_pad), p4.dtype),
        grid_spec=pltpu.PrefetchScalarGridSpec(
            num_scalar_prefetch=0,
            grid=grid,
            in_specs=[pl.BlockSpec((1, no_pad, hw_tile), lambda i, j: (i, 0, j))],
            out_specs=pl.BlockSpec((1, hw_tile, no_pad), lambda i, j: (i, j, 0)),
        ),
        compiler_params=_COMPILER_PARAMS,
    )(x3)

    return out3[:, :, :no].reshape(bs, na, ny, nx, no)


# --------------------------------------------------------------------------------------
# Kernel 2: fused inference-mode decode on the (bs, na*no, ny, nx) layout
# --------------------------------------------------------------------------------------
def _decode_kernel(p_ref, g_ref, a_ref, o_ref, *, na, no, stride):
    # p_ref: (1, na*no, ny_t, nx)   g_ref: (2, ny_t, nx)   a_ref: (na, 2, 1, nx)
    blk = p_ref[0].astype(jnp.float32)                      # (na*no, ny_t, nx)
    x = blk.reshape(na, no, blk.shape[1], blk.shape[2])     # leading-dim split only (free)
    g = g_ref[...].astype(jnp.float32)                      # g[0]=x-grid, g[1]=y-grid
    aw = a_ref[...].astype(jnp.float32)                     # anchor_vec broadcast over nx

    sig = jax.nn.sigmoid(x[:, :4])                          # EUP, f32
    xy = (sig[:, :2] * 2.0 - 0.5 + g[None]) * stride        # (na, 2, ny_t, nx)
    wh = (sig[:, 2:4] * 2.0) ** 2 * aw * stride             # (na, 2, ny_t, nx)

    # Softmax over the anchor axis (matches torch F.softmax default dim=1 for 5-D io).
    logits = x[:, 4:]
    m = jnp.max(logits, axis=0, keepdims=True)
    e = jnp.exp(logits - m)
    cls = e / jnp.sum(e, axis=0, keepdims=True)

    io = jnp.concatenate([xy, wh, cls], axis=1)             # (na, no, ny_t, nx)
    o_ref[0] = io.reshape(na * no, io.shape[2], io.shape[3]).astype(o_ref.dtype)


def _jde_decode(p4, anchor_vec, stride, na, no):
    """Fused decode; returns decoded predictions in the (bs, na*no, ny, nx) layout."""
    bs, c, ny, nx = p4.shape
    assert c == na * no

    # Pixel grid, matching torch.meshgrid([arange(ny), arange(nx)]) -> stack((xv, yv)).
    yv, xv = jnp.meshgrid(jnp.arange(ny, dtype=jnp.float32),
                          jnp.arange(nx, dtype=jnp.float32), indexing="ij")
    g = jnp.stack([xv, yv], axis=0)                                       # (2, ny, nx)
    # anchor_vec laid out so the kernel only needs a cheap sublane broadcast.
    aw = jnp.broadcast_to(
        anchor_vec.astype(jnp.float32).reshape(na, 2, 1, 1), (na, 2, 1, nx))

    # Tile ny so the double-buffered (in + out) working set stays far under VMEM
    # (v7x has only 64 MiB physical VMEM).
    itemsize = p4.dtype.itemsize
    if ny % 8 == 0:
        row_bytes = max(1, c * nx * itemsize)
        rows = max(8, min(ny, (4 * 1024 * 1024) // row_bytes))
        ny_tile = max(8, (rows // 8) * 8)
    else:
        ny_tile = ny  # full-dim block is always legal

    grid = (bs, pl.cdiv(ny, ny_tile))
    kernel = functools.partial(_decode_kernel, na=na, no=no, stride=float(stride))
    return pl.pallas_call(
        kernel,
        out_shape=jax.ShapeDtypeStruct(p4.shape, p4.dtype),
        grid_spec=pltpu.PrefetchScalarGridSpec(
            num_scalar_prefetch=0,
            grid=grid,
            in_specs=[
                pl.BlockSpec((1, c, ny_tile, nx), lambda b, t: (b, 0, t, 0)),
                pl.BlockSpec((2, ny_tile, nx), lambda b, t: (0, t, 0)),
                pl.BlockSpec((na, 2, 1, nx), lambda b, t: (0, 0, 0, 0)),
            ],
            out_specs=pl.BlockSpec((1, c, ny_tile, nx), lambda b, t: (b, 0, t, 0)),
        ),
        compiler_params=_COMPILER_PARAMS,
    )(p4, g, aw)


# --------------------------------------------------------------------------------------
# Module wrapper mirroring the PyTorch JDELayer
# --------------------------------------------------------------------------------------
class JDELayer:
    """JAX/Pallas port of yolor's JDELayer forward."""

    def __init__(self, anchors, nc, img_size, yolo_index, layers, stride):
        self.anchors = jnp.asarray(anchors, dtype=jnp.float32).reshape(-1, 2)
        self.index = yolo_index
        self.layers = layers
        self.stride = float(stride)
        self.nl = len(layers)
        self.na = len(anchors)
        self.nc = nc
        self.no = nc + 5
        self.nx, self.ny = 0, 0
        self.anchor_vec = self.anchors / self.stride
        self.training = True  # same default as torch.nn.Module

    def train(self):
        self.training = True
        return self

    def eval(self):
        self.training = False
        return self

    def __call__(self, p, out=None):
        # TODO(synk): ASFF and ONNX_EXPORT branches are compile-time disabled in the
        # reference module and are not translated.
        bs, c, ny, nx = p.shape
        assert c == self.na * self.no
        self.nx, self.ny = nx, ny

        p_perm = _permute_channels_last(p, self.na, self.no)      # (bs, na, ny, nx, no)
        if self.training:
            return p_perm

        io_pre = _jde_decode(p, self.anchor_vec, self.stride, self.na, self.no)
        io = _permute_channels_last(io_pre, self.na, self.no).reshape(bs, -1, self.no)
        return io, p_perm


# --------------------------------------------------------------------------------------
# Self-test
# --------------------------------------------------------------------------------------
if __name__ == "__main__":
    key = jax.random.PRNGKey(0)

    anchors = [(10.0, 13.0), (16.0, 30.0), (33.0, 23.0)]
    nc, stride = 2, 4.0
    bs, ny, nx = 2, 16, 16
    module = JDELayer(anchors, nc, img_size=(64, 64), yolo_index=0, layers=[-2],
                      stride=stride)

    p = jax.random.normal(key, (bs, module.na * module.no, ny, nx), dtype=jnp.float32)
    outputs = {}  # unused by forward (ASFF disabled), present for signature parity

    # ---- training mode (nn.Module default): reshaped/permuted predictions ----
    pred_train = module(p, outputs)
    pred_train = jax.block_until_ready(pred_train)
    ref_train = p.reshape(bs, module.na, module.no, ny, nx).transpose(0, 1, 3, 4, 2)
    assert pred_train.shape == (bs, module.na, ny, nx, module.no)
    assert pred_train.dtype == p.dtype
    assert jnp.allclose(pred_train, ref_train, atol=1e-6, rtol=1e-6)

    # ---- inference mode: (decoded boxes, raw permuted predictions) ----
    io, p_perm = module.eval()(p, outputs)
    io, p_perm = jax.block_until_ready((io, p_perm))

    # Plain-JAX reference mirroring the PyTorch eval branch.
    yv, xv = jnp.meshgrid(jnp.arange(ny, dtype=jnp.float32),
                          jnp.arange(nx, dtype=jnp.float32), indexing="ij")
    grid_xy = jnp.stack([xv, yv], axis=-1)                                  # (ny, nx, 2)
    anchor_wh = module.anchor_vec.reshape(1, module.na, 1, 1, 2)
    q = ref_train.astype(jnp.float32)
    ref_xy = (jax.nn.sigmoid(q[..., :2]) * 2.0 - 0.5 + grid_xy) * stride
    ref_wh = ((jax.nn.sigmoid(q[..., 2:4]) * 2.0) ** 2 * anchor_wh) * stride
    ref_cls = jax.nn.softmax(q[..., 4:], axis=1)  # torch F.softmax default dim=1 (5-D)
    ref_io = jnp.concatenate([ref_xy, ref_wh, ref_cls], axis=-1).reshape(bs, -1, module.no)

    assert io.shape == (bs, module.na * ny * nx, module.no)
    assert p_perm.shape == (bs, module.na, ny, nx, module.no)
    assert jnp.allclose(p_perm, ref_train, atol=1e-6, rtol=1e-6)
    assert jnp.allclose(io, ref_io, atol=1e-5, rtol=1e-5)

    print("KERNEL_OK")
</pallas_src>

<mosaic_0001>
module attributes {stable_mosaic.version = 11 : i64} {
  func.func @_permute_kernel(%arg0: i32, %arg1: i32, %arg2: memref<1x8x256xf32, #tpu.memory_space<vmem>>, %arg3: memref<1x256x8xf32, #tpu.memory_space<vmem>>) attributes {dimension_semantics = [#tpu.dimension_semantics<parallel>, #tpu.dimension_semantics<parallel>], iteration_bounds = array<i64: 6, 1>, scalar_prefetch = 0 : i64, scratch_operands = 0 : i64, tpu.core_type = #tpu.core_type<tc>, window_params = [{transform_indices = @transform_0, window_bounds = array<i64: 1, 8, 256>}, {transform_indices = @transform_1, window_bounds = array<i64: 1, 256, 8>}]} {
    %c0 = arith.constant 0 : index
    %c0_0 = arith.constant 0 : index
    %c0_1 = arith.constant 0 : index
    %0 = vector.load %arg2[%c0, %c0_0, %c0_1] : memref<1x8x256xf32, #tpu.memory_space<vmem>>, vector<1x8x256xf32>
    %1 = vector.shape_cast %0 : vector<1x8x256xf32> to vector<8x256xf32>
    %2 = tpu.transpose %1, [1, 0] : vector<8x256xf32> -> vector<256x8xf32>
    %c0_2 = arith.constant 0 : index
    %c0_3 = arith.constant 0 : index
    %c0_4 = arith.constant 0 : index
    %3 = vector.load %arg3[%c0_2, %c0_3, %c0_4] : memref<1x256x8xf32, #tpu.memory_space<vmem>>, vector<1x256x8xf32>
    %4 = vector.shape_cast %3 : vector<1x256x8xf32> to vector<256x8xf32>
    %5 = vector.shape_cast %2 : vector<256x8xf32> to vector<1x256x8xf32>
    tpu.vector_store %arg3[%c0_2, %c0_3, %c0_4], %5 {strides = array<i32>} : memref<1x256x8xf32, #tpu.memory_space<vmem>>, vector<1x256x8xf32>,
    return
  }
  func.func @transform_0(%arg0: i32, %arg1: i32) -> (i32, i32, i32) {
    %c0_i32 = arith.constant 0 : i32
    %c0_i32_0 = arith.constant 0 : i32
    return %arg0, %c0_i32, %arg1 : i32, i32, i32
  }
  func.func @transform_1(%arg0: i32, %arg1: i32) -> (i32, i32, i32) {
    %c0_i32 = arith.constant 0 : i32
    %c0_i32_0 = arith.constant 0 : i32
    return %arg0, %arg1, %c0_i32 : i32, i32, i32
  }
}

</mosaic_0001>

<bundles_post_ra>
// kernel: tpu_custom_call.1
= control target key start
LH: loop header
LB: loop body
LE: loop exit
PB: predicated region body
PF: predicated region fallthrough
CT: control target
= control target key end

     0   :  { %6 = vsyncpa [#allocation3], 0  ;;  %s712_s0 = inlined_call_operand.hbm [shape: f32[6,8,256], index: 0, kind: input, shape index: {}]   ;;  %s713_s1 = inlined_call_operand.vmem [shape: f32[6,256,8], index: 1, kind: output, shape index: {}]  }
   0x1   :  { %8 = vsyncpa [#allocation3 + $0x1], 0  ;;  %s521_s6 = smov 0   ;;  %s523_s7 = smov 0  }
   0x2   :  { %s525_s8 = smov 0   ;;  %s527_s9 = smov 0  }
   0x3   :  { %s529_s10 = smov 0   ;;  %s531_s11 = smov 0  }
   0x4 LB: > { %s357_s12 = sadd.s32 4294967295, %s508_s11   ;;  %s26_s13 = sadd.s32 1, %s504_s10  ;;  %s508_s11 = sphi %s531_s11, %s14_s11   ;;  %s504_s10 = sphi %s529_s10, %s723_s10   ;;  %s500_s9 = sphi %s527_s9, %s722_s9   ;;  %s496_s8 = sphi %s525_s8, %s721_s8   ;;  %s492_s7 = sphi %s523_s7, %s720_s7   ;;  %s488_s6 = sphi %s521_s6, %s719_s6  }
   0x5   : > { %p28_p0 = scmp.ge.s32.totalorder %s26_s13, 6  ;;  %s35_s14 = sadd.s32 1, %s496_s8 }
   0x6   : > { %p42_p1 = scmp.ne.s32.totalorder %s496_s8, %s492_s7  ;;  %p43_p2 = scmp.eq.s32.totalorder %s508_s11, 0 }
   0x7   : > { %s725_s13 = smov (%p28_p0, %s26_s13), 0  ;;  %p48_p4 = scmp.ne.s32.totalorder %s492_s7, %s488_s6 }
   0x8   : > { %p557_p3 = por %p43_p2, %p42_p1  ;;  %s30_s16 = ssub.s32 %s504_s10, %s725_s13 }
   0x9   : > { %p49_p5 = scmp.eq.s32.totalorder %s357_s12, 0  ;;  %p33_p6 = scmp.eq.s32.totalorder %s30_s16, 0 }
   0xa   : > { %p378_p8 = scmp.lt.s32.totalorder %s508_s11, 6  ;;  %s100_s19 = sand.u32 1, %s496_s8  }
   0xb   : > { %p564_p7 = por %p49_p5, %p48_p4  ;;  %s370_s20 = sshll.u32 %s504_s10, 8 }
   0xc   : > { %s570_s18 = scalar_select %p33_p6, %s496_s8, %s35_s14  }
   0xd   : > { %s361_s21 = sshll.u32 %s100_s19, 4  ;;  %s577_s24 = scalar_lea.hbm %s712_s0, %s370_s20 }
   0xe   : > { %s104_s25 = scalar_lea.vmem [#allocation2], %s361_s21  ;;  %p581_p9 = pnand %p378_p8, %p557_p3 }
   0xf   : > { %s114_s26 = sshll.u32 %s104_s25, 4  ;;  %s101_s28 = scalar_lea.sflag [#allocation3], %s100_s19  ;;  %s585_s26 = int_to_ptr.vmem [resolvable:$true] %s114_s26 }
  0x10   : > { %s428_s29 = scalar_lea.hbm %s577_s24, 256  ;;  %p430_p13 = pneg %p581_p9 }
  0x11   : > { %p429_p12 = scmp.ne.s32.totalorder %s577_s24, %s428_s29  ;;  %s433_s3 = scalar_lea.hbm %s712_s0, 1536 }
  0x12   : > { %p434_p2 = scmp.lt.u32.totalorder %s577_s24, %s712_s0  ;;  %p435_p3 = scmp.lt.u32.totalorder %s433_s3, %s428_s29 }
  0x13   : > { %p431_p0 = pnand %p430_p13, %p429_p12  ;;  %p437_p5 = scmp.lt.u32.totalorder %s428_s29, %s577_s24 }
  0x14   : > { %p436_p4 = por %p435_p3, %p434_p2 }
  0x15   : > { %p432_p1 = pneg %p431_p0 }
  0x16   : > { %p438_p6 = por %p437_p5, %p436_p4 }
  0x18   : > { %p439_p8 = pnand %p438_p6, %p432_p1 }
  0x1a   : > { %442 = shalt.err (!%p439_p8)
}
  0x1b   : > { %s443_s6 = scalar_lea.vmem %s585_s26, 256  ;;  %s510_s12 = smov [#allocation2]  }
  0x1c   : > { %p444_p12 = scmp.ne.s32.totalorder %s585_s26, %s443_s6  ;;  %s448_s14 = sshll.u32 %s510_s12, 4  ;;  %s449_s14 = int_to_ptr.vmem [resolvable:$false] %s448_s14 }
  0x1d   : > { %s450_s15 = scalar_lea.vmem %s449_s14, 512  ;;  %p451_p11 = scmp.lt.s32.totalorder %s585_s26, %s449_s14 }
  0x1e   : > { %p446_p0 = pnand %p444_p12, %p430_p13  ;;  %p452_p2 = scmp.lt.s32.totalorder %s450_s15, %s443_s6 }
  0x20   : > { %p447_p10 = pneg %p446_p0  ;;  %p453_p3 = por %p452_p2, %p451_p11 }
  0x22   : > { %p454_p4 = pnand %p453_p3, %p447_p10 }
  0x24   : > { %457 = shalt.err (!%p454_p4)
}
  0x25   : > { %377 = dma.hbm_to_vmem [thread:$0]  (!%p581_p9), %s577_s24, 256, %s585_s26, %s101_s28  }
  0x26   : > { %p717_p1 = scmp.lt.s32.totalorder %s508_s11, 7  ;;  %p718_p5 = scmp.ge.s32.totalorder %s508_s11, 1 }
  0x28   : > { %p120_p13 = pnand %p718_p5, %p717_p1 }
  0x29   : > { %s125_s16 = sand.u32 (!%p120_p13), 1, %s492_s7  }
  0x2a   : > { %123 = sbr.rel (%p120_p13) target bundleno = 305 (0x131), region = 24  ;;  %s365_s19 = sshll.u32 (!%p120_p13), %s125_s16, 4 }
  0x2b   : > { %s126_s20 = scalar_lea.sflag (!%p120_p13), [#allocation3], %s125_s16  ;;  %s129_s21 = scalar_lea.vmem (!%p120_p13), [#allocation2], %s365_s19 }
  0x31   : > { %483 = dma.done.wait (%p564_p7), %s126_s20, 256  }
  0x32   : > { %485 = vsyncadd (%p564_p7), %s126_s20, 4294967040  ;;  %v163_v0 = vld [vmem:[%s129_s21] sm:$0xff]  ;;  %v164_v1 = vld [vmem:[%s129_s21 + $0x8] sm:$0xff]  ;;  %p154_p9 = scmp.lt.s32.totalorder %s500_s9, 5  ;;  %vm229_vm0 = vcmask 64512  }
  0x33   : > { %165 = vxpose.xlu0.b32.start.end [1/1] (short) %v163_v0, 128 }
  0x34   : > { %s727_s9 = smov (!%p154_p9, %s500_s9), 5 }
  0x35   : > { %s371_s22 = sshll.u32 %s727_s9, 8 }
  0x36   : > { %s628_s25 = scalar_lea.vmem %s713_s1, %s371_s22 }
  0x70   : > { %197 = vxpose.xlu0.b32.start.end [1/1] (short) %v164_v1, 128 }
  0xb3   : > { %v181_v2 = vpop.trf.xlu0 }
  0xb4   : > { %230 = vst.msk [vmem:[%s628_s25] sm:$0xff] %vm229_vm0, %v181_v2 }
  0xb7   : > { %v182_v3 = vpop.trf.xlu0 }
  0xb8   : > { %231 = vst.msk [vmem:[%s628_s25 + $0x8] sm:$0xff] %vm229_vm0, %v182_v3 }
  0xbb   : > { %v183_v4 = vpop.trf.xlu0 }
  0xbc   : > { %232 = vst.msk [vmem:[%s628_s25 + $0x10] sm:$0xff] %vm229_vm0, %v183_v4 }
  0xbf   : > { %v184_v5 = vpop.trf.xlu0 }
  0xc0   : > { %233 = vst.msk [vmem:[%s628_s25 + $0x18] sm:$0xff] %vm229_vm0, %v184_v5 }
  0xc3   : > { %v185_v6 = vpop.trf.xlu0 }
  0xc4   : > { %234 = vst.msk [vmem:[%s628_s25 + $0x20] sm:$0xff] %vm229_vm0, %v185_v6 }
  0xc7   : > { %v186_v7 = vpop.trf.xlu0 }
  0xc8   : > { %235 = vst.msk [vmem:[%s628_s25 + $0x28] sm:$0xff] %vm229_vm0, %v186_v7 }
  0xcb   : > { %v187_v8 = vpop.trf.xlu0 }
  0xcc   : > { %236 = vst.msk [vmem:[%s628_s25 + $0x30] sm:$0xff] %vm229_vm0, %v187_v8 }
  0xcf   : > { %v188_v9 = vpop.trf.xlu0 }
  0xd0   : > { %237 = vst.msk [vmem:[%s628_s25 + $0x38] sm:$0xff] %vm229_vm0, %v188_v9 }
  0xd3   : > { %v189_v10 = vpop.trf.xlu0 }
  0xd4   : > { %238 = vst.msk [vmem:[%s628_s25 + $0x40] sm:$0xff] %vm229_vm0, %v189_v10 }
  0xd7   : > { %v190_v11 = vpop.trf.xlu0 }
  0xd8   : > { %239 = vst.msk [vmem:[%s628_s25 + $0x48] sm:$0xff] %vm229_vm0, %v190_v11 }
  0xdb   : > { %v191_v12 = vpop.trf.xlu0 }
  0xdc   : > { %240 = vst.msk [vmem:[%s628_s25 + $0x50] sm:$0xff] %vm229_vm0, %v191_v12 }
  0xdf   : > { %v192_v13 = vpop.trf.xlu0 }
  0xe0   : > { %241 = vst.msk [vmem:[%s628_s25 + $0x58] sm:$0xff] %vm229_vm0, %v192_v13 }
  0xe3   : > { %v193_v14 = vpop.trf.xlu0 }
  0xe4   : > { %242 = vst.msk [vmem:[%s628_s25 + $0x60] sm:$0xff] %vm229_vm0, %v193_v14 }
  0xe7   : > { %v194_v15 = vpop.trf.xlu0 }
  0xe8   : > { %243 = vst.msk [vmem:[%s628_s25 + $0x68] sm:$0xff] %vm229_vm0, %v194_v15 }
  0xeb   : > { %v195_v16 = vpop.trf.xlu0 }
  0xec   : > { %244 = vst.msk [vmem:[%s628_s25 + $0x70] sm:$0xff] %vm229_vm0, %v195_v16 }
  0xef   : > { %v196_v17 = vpop.trf.xlu0 }
  0xf0   : > { %245 = vst.msk [vmem:[%s628_s25 + $0x78] sm:$0xff] %vm229_vm0, %v196_v17 }
  0xf3   : > { %v213_v18 = vpop.trf.xlu0 }
  0xf4   : > { %246 = vst.msk [vmem:[%s628_s25 + $0x80] sm:$0xff] %vm229_vm0, %v213_v18 }
  0xf7   : > { %v214_v19 = vpop.trf.xlu0 }
  0xf8   : > { %247 = vst.msk [vmem:[%s628_s25 + $0x88] sm:$0xff] %vm229_vm0, %v214_v19 }
  0xfb   : > { %v215_v20 = vpop.trf.xlu0 }
  0xfc   : > { %248 = vst.msk [vmem:[%s628_s25 + $0x90] sm:$0xff] %vm229_vm0, %v215_v20 }
  0xff   : > { %v216_v21 = vpop.trf.xlu0 }
 0x100   : > { %249 = vst.msk [vmem:[%s628_s25 + $0x98] sm:$0xff] %vm229_vm0, %v216_v21 }
 0x103   : > { %v217_v22 = vpop.trf.xlu0 }
 0x104   : > { %250 = vst.msk [vmem:[%s628_s25 + $0xa0] sm:$0xff] %vm229_vm0, %v217_v22 }
 0x107   : > { %v218_v23 = vpop.trf.xlu0 }
 0x108   : > { %251 = vst.msk [vmem:[%s628_s25 + $0xa8] sm:$0xff] %vm229_vm0, %v218_v23 }
 0x10b   : > { %v219_v24 = vpop.trf.xlu0 }
 0x10c   : > { %252 = vst.msk [vmem:[%s628_s25 + $0xb0] sm:$0xff] %vm229_vm0, %v219_v24 }
 0x10f   : > { %v220_v25 = vpop.trf.xlu0 }
 0x110   : > { %253 = vst.msk [vmem:[%s628_s25 + $0xb8] sm:$0xff] %vm229_vm0, %v220_v25 }
 0x113   : > { %v221_v26 = vpop.trf.xlu0 }
 0x114   : > { %254 = vst.msk [vmem:[%s628_s25 + $0xc0] sm:$0xff] %vm229_vm0, %v221_v26 }
 0x117   : > { %v222_v27 = vpop.trf.xlu0 }
 0x118   : > { %255 = vst.msk [vmem:[%s628_s25 + $0xc8] sm:$0xff] %vm229_vm0, %v222_v27 }
 0x11b   : > { %v223_v28 = vpop.trf.xlu0 }
 0x11c   : > { %256 = vst.msk [vmem:[%s628_s25 + $0xd0] sm:$0xff] %vm229_vm0, %v223_v28 }
 0x11f   : > { %v224_v29 = vpop.trf.xlu0 }
 0x120   : > { %257 = vst.msk [vmem:[%s628_s25 + $0xd8] sm:$0xff] %vm229_vm0, %v224_v29 }
 0x123   : > { %v225_v30 = vpop.trf.xlu0 }
 0x124   : > { %258 = vst.msk [vmem:[%s628_s25 + $0xe0] sm:$0xff] %vm229_vm0, %v225_v30 }
 0x127   : > { %v226_v31 = vpop.trf.xlu0 }
 0x128   : > { %259 = vst.msk [vmem:[%s628_s25 + $0xe8] sm:$0xff] %vm229_vm0, %v226_v31 }
 0x12b   : > { %v227_v32 = vpop.trf.xlu0 }
 0x12c   : > { %260 = vst.msk [vmem:[%s628_s25 + $0xf0] sm:$0xff] %vm229_vm0, %v227_v32 }
 0x12f   : > { %v228_v33 = vpop.trf.xlu0 }
 0x130   : > { %261 = vst.msk [vmem:[%s628_s25 + $0xf8] sm:$0xff] %vm229_vm0, %v228_v33 }
 0x131 PF: > { %s14_s11 = sadd.s32 1, %s508_s11   ;;  %s719_s6 = smov %s492_s7 }
 0x132   : > { %p11_p7 = scmp.ge.s32.totalorder %s14_s11, 8   ;;  %s720_s7 = smov %s496_s8 }
 0x133   : > { %s721_s8 = smov %s570_s18  ;;  %s722_s9 = smov %s504_s10 }
 0x134   : > { %s723_s10 = smov %s725_s13  ;;  %13 = sbr.rel (!%p11_p7) target bundleno = 4 (0x4), region = 64 }
 0x13b   :  { %292 = vsyncpa [#allocation3], 1 }
 0x13c   :  { %294 = vsyncpa [#allocation3 + $0x1], 1 }

</bundles_post_ra>
